<compile_context>
chip_gen: v7x
topology: tpu7x:2x2x1
jax: 0.10.0
libtpu: 0.0.40
codegen_flags: <defaults>
</compile_context>

<pallas_src>
import math
import jax
import jax.numpy as jnp
from jax.experimental import pallas as pl
from jax.experimental.pallas import tpu as pltpu


def _attn_kernel(hid_ref, enc_ref, wvh_ref, wve_ref, c0_ref, out_ref, scr_ref):
    # hid_ref: (2H, B)        enc_ref: (bt, B, 2H)   <- streamed sequence tile
    # wvh_ref: (2H, 1)        wve_ref: (1, 2H)       <- v folded into the Linear
    # c0_ref:  (1, 1)  (= v . bias)
    # out_ref: (T, B)  softmax probabilities (resident across the grid)
    # scr_ref: (T, B)  f32 raw-score accumulator
    i = pl.program_id(0)
    bt = enc_ref.shape[0]

    # ---- streamed partial scores for this sequence tile:  (bt, B) ----------
    enc = enc_ref[...].astype(jnp.float32)                 # (bt, B, 2H)
    wve = wve_ref[...]                                     # (1, 2H)
    part = jnp.sum(enc * wve[None, :, :], axis=-1)         # lane reduce -> (bt, B)
    row = pl.multiple_of(i * bt, bt)
    scr_ref[pl.ds(row, bt), :] = part

    # ---- finalize: hidden term + softmax over the full sequence ------------
    @pl.when(i == pl.num_programs(0) - 1)
    def _finalize():
        hid = hid_ref[...].astype(jnp.float32)             # (2H, B)
        # per-batch hidden contribution + v.bias  -> (1, B)
        hs = jnp.sum(hid * wvh_ref[...], axis=0, keepdims=True) + c0_ref[...]
        scores = scr_ref[...] + hs                         # (T, B), f32
        m = jnp.max(scores, axis=0, keepdims=True)         # (1, B)
        ex = jnp.exp(scores - m)                           # EUP
        denom = jnp.sum(ex, axis=0, keepdims=True)         # (1, B)
        # Multiply by the reciprocal (EUP) instead of dividing on the VPU.
        # approx=True would be a drop-in; kept exact so the self-test can
        # assert tight f32 tolerances (denom is only B values per call).
        inv = pl.reciprocal(denom, approx=False)
        out_ref[...] = (ex * inv).astype(out_ref.dtype)


def _pick_block_t(T, B, H2, itemsize):
    """Largest sequence tile (multiple of 8, dividing T) whose double-buffered
    enc block stays inside a conservative VMEM budget (safe on v7x's 64 MiB)."""
    budget = 8 * 1024 * 1024
    cap = max(8, budget // (2 * B * H2 * itemsize))
    bt = min(T, int(cap))
    bt = max(8, bt - bt % 8)
    while bt > 8 and T % bt != 0:
        bt -= 8
    if T % bt != 0:
        bt = T                      # awkward T: single resident block
    return bt


def attention_forward(hidden, encoder_outputs, attn_weight, attn_bias, v,
                      *, block_t=None):
    """hidden: (B, 2H)   encoder_outputs: (T, B, 2H)   attn_weight: (H, 4H)."""
    T, B, H2 = encoder_outputs.shape
    H = attn_weight.shape[0]
    assert H2 == 2 * H and attn_weight.shape[1] == 4 * H

    f32 = jnp.float32
    # --- algebraic fold of v into the Linear (parameter prep, tiny) ---------
    wv = attn_weight.astype(f32).T @ v.astype(f32)          # (4H,)
    wv_h = wv[:H2].reshape(H2, 1)                           # hidden half of concat
    wv_e = wv[H2:].reshape(1, H2)                           # encoder half of concat
    c0 = jnp.dot(v.astype(f32), attn_bias.astype(f32)).reshape(1, 1)
    hid_t = jnp.transpose(hidden, (1, 0))                   # (2H, B) -- tiny

    if block_t is None:
        block_t = _pick_block_t(T, B, H2, encoder_outputs.dtype.itemsize)
    assert T % block_t == 0, (T, block_t)

    probs_tb = pl.pallas_call(
        _attn_kernel,
        out_shape=jax.ShapeDtypeStruct((T, B), jnp.float32),
        grid=(T // block_t,),
        in_specs=[
            pl.BlockSpec((H2, B), lambda i: (0, 0)),             # hid_t
            pl.BlockSpec((block_t, B, H2), lambda i: (i, 0, 0)),  # enc (streamed)
            pl.BlockSpec((H2, 1), lambda i: (0, 0)),             # wv_h
            pl.BlockSpec((1, H2), lambda i: (0, 0)),             # wv_e
            pl.BlockSpec((1, 1), lambda i: (0, 0)),              # c0
        ],
        out_specs=pl.BlockSpec((T, B), lambda i: (0, 0)),
        scratch_shapes=[pltpu.VMEM((T, B), jnp.float32)],
        compiler_params=pltpu.CompilerParams(
            dimension_semantics=("arbitrary",)),   # resident accumulator axis
    )(hid_t, encoder_outputs, wv_h, wv_e, c0)

    # tiny (T, B) -> (B, 1, T) layout plumbing for the module's return shape
    return jnp.transpose(probs_tb, (1, 0))[:, None, :]


def _reference(hidden, encoder_outputs, attn_weight, attn_bias, v):
    T, B, H2 = encoder_outputs.shape
    H_rep = jnp.broadcast_to(hidden[None], (T, B, H2)).transpose(1, 0, 2)   # (B, T, 2H)
    enc = encoder_outputs.transpose(1, 0, 2)                                # (B, T, 2H)
    cat = jnp.concatenate([H_rep, enc], axis=2)                             # (B, T, 4H)
    energy = cat @ attn_weight.T + attn_bias                                # (B, T, H)
    score = jnp.einsum("bth,h->bt", energy, v)                              # (B, T)
    w = jax.nn.softmax(score, axis=1)
    return w[:, None, :]


if __name__ == "__main__":
    hidden_size = 32
    batch = 2
    max_len = 128                   # several sequence tiles -> exercises the pipeline
    H2 = 2 * hidden_size            # per-tensor feature dim (concat -> 4*hidden_size)

    key = jax.random.PRNGKey(0)
    k_hid, k_enc, k_v, k_w, k_b = jax.random.split(key, 5)

    # Inputs.
    hidden = jax.random.normal(k_hid, (batch, H2), dtype=jnp.float32)
    encoder_outputs = jax.random.normal(k_enc, (max_len, batch, H2), dtype=jnp.float32)

    # Parameters (deterministic init mimicking the PyTorch module's __init__).
    stdv = 1.0 / math.sqrt(hidden_size)
    v_param = stdv * jax.random.normal(k_v, (hidden_size,), dtype=jnp.float32)
    lin_bound = 1.0 / math.sqrt(4 * hidden_size)
    attn_weight = jax.random.uniform(
        k_w, (hidden_size, 4 * hidden_size), minval=-lin_bound, maxval=lin_bound,
        dtype=jnp.float32)
    attn_bias = jax.random.uniform(
        k_b, (hidden_size,), minval=-lin_bound, maxval=lin_bound, dtype=jnp.float32)

    # block_t=32 forces a multi-step grid at this small size so the streamed
    # accumulation + fused-softmax-finalize path is exercised.
    out = attention_forward(hidden, encoder_outputs, attn_weight, attn_bias,
                            v_param, block_t=32)
    out = jax.block_until_ready(out)

    ref = _reference(hidden, encoder_outputs, attn_weight, attn_bias, v_param)
    assert out.shape == (batch, 1, max_len), out.shape
    assert jnp.allclose(out, ref, atol=1e-5, rtol=1e-5), \
        float(jnp.max(jnp.abs(out - ref)))

    print("KERNEL_OK")
</pallas_src>

<mosaic_0001>
module attributes {stable_mosaic.version = 11 : i64} {
  func.func @_attn_kernel(%arg0: i32, %arg1: memref<64x2xf32, #tpu.memory_space<vmem>>, %arg2: memref<32x2x64xf32, #tpu.memory_space<vmem>>, %arg3: memref<64x1xf32, #tpu.memory_space<vmem>>, %arg4: memref<1x64xf32, #tpu.memory_space<vmem>>, %arg5: memref<1x1xf32, #tpu.memory_space<vmem>>, %arg6: memref<128x2xf32, #tpu.memory_space<vmem>>, %arg7: memref<128x2xf32, #tpu.memory_space<vmem>>) attributes {dimension_semantics = [#tpu.dimension_semantics<arbitrary>], iteration_bounds = array<i64: 4>, scalar_prefetch = 0 : i64, scratch_operands = 1 : i64, tpu.core_type = #tpu.core_type<tc>, window_params = [{pipeline_mode = #tpu.pipeline_mode<synchronous>, transform_indices = @transform_0, window_bounds = array<i64: 64, 2>}, {transform_indices = @transform_1, window_bounds = array<i64: 32, 2, 64>}, {pipeline_mode = #tpu.pipeline_mode<synchronous>, transform_indices = @transform_2, window_bounds = array<i64: 64, 1>}, {pipeline_mode = #tpu.pipeline_mode<synchronous>, transform_indices = @transform_3, window_bounds = array<i64: 1, 64>}, {pipeline_mode = #tpu.pipeline_mode<synchronous>, transform_indices = @transform_4, window_bounds = array<i64: 1, 1>}, {pipeline_mode = #tpu.pipeline_mode<synchronous>, transform_indices = @transform_5, window_bounds = array<i64: 128, 2>}]} {
    %c0 = arith.constant 0 : index
    %c0_0 = arith.constant 0 : index
    %c0_1 = arith.constant 0 : index
    %0 = vector.load %arg2[%c0, %c0_0, %c0_1] : memref<32x2x64xf32, #tpu.memory_space<vmem>>, vector<32x2x64xf32>
    %c0_2 = arith.constant 0 : index
    %c0_3 = arith.constant 0 : index
    %1 = vector.load %arg4[%c0_2, %c0_3] : memref<1x64xf32, #tpu.memory_space<vmem>>, vector<1x64xf32>
    %2 = vector.shape_cast %1 : vector<1x64xf32> to vector<1x1x64xf32>
    %3 = vector.broadcast %2 : vector<1x1x64xf32> to vector<32x2x64xf32>
    %4 = arith.mulf %0, %3 : vector<32x2x64xf32>
    %cst = arith.constant dense<0.000000e+00> : vector<32x2xf32>
    %5 = vector.multi_reduction <add>, %4, %cst [2] : vector<32x2x64xf32> to vector<32x2xf32>
    %c32_i32 = arith.constant 32 : i32
    %6 = arith.muli %arg0, %c32_i32 : i32
    %7 = tpu.assume_multiple %6, 32 : i32
    %8 = arith.index_cast %7 : i32 to index
    %c0_4 = arith.constant 0 : index
    %9 = vector.load %arg7[%8, %c0_4] : memref<128x2xf32, #tpu.memory_space<vmem>>, vector<32x2xf32>
    tpu.vector_store %arg7[%8, %c0_4], %5 {strides = array<i32>} : memref<128x2xf32, #tpu.memory_space<vmem>>, vector<32x2xf32>,
    %c3_i32 = arith.constant 3 : i32
    %10 = arith.cmpi eq, %arg0, %c3_i32 : i32
    %11 = arith.extui %10 : i1 to i32
    %c0_i32 = arith.constant 0 : i32
    %12 = arith.cmpi ne, %11, %c0_i32 : i32
    scf.if %12 {
      %c0_5 = arith.constant 0 : index
      %c0_6 = arith.constant 0 : index
      %13 = vector.load %arg1[%c0_5, %c0_6] : memref<64x2xf32, #tpu.memory_space<vmem>>, vector<64x2xf32>
      %c0_7 = arith.constant 0 : index
      %c0_8 = arith.constant 0 : index
      %14 = vector.load %arg3[%c0_7, %c0_8] : memref<64x1xf32, #tpu.memory_space<vmem>>, vector<64x1xf32>
      %15 = vector.broadcast %14 : vector<64x1xf32> to vector<64x2xf32>
      %16 = arith.mulf %13, %15 : vector<64x2xf32>
      %cst_9 = arith.constant dense<0.000000e+00> : vector<2xf32>
      %17 = vector.multi_reduction <add>, %16, %cst_9 [0] : vector<64x2xf32> to vector<2xf32>
      %18 = vector.shape_cast %17 : vector<2xf32> to vector<1x2xf32>
      %c0_10 = arith.constant 0 : index
      %c0_11 = arith.constant 0 : index
      %19 = vector.load %arg5[%c0_10, %c0_11] : memref<1x1xf32, #tpu.memory_space<vmem>>, vector<1x1xf32>
      %20 = vector.broadcast %19 : vector<1x1xf32> to vector<1x2xf32>
      %21 = arith.addf %18, %20 : vector<1x2xf32>
      %c0_12 = arith.constant 0 : index
      %c0_13 = arith.constant 0 : index
      %22 = vector.load %arg7[%c0_12, %c0_13] : memref<128x2xf32, #tpu.memory_space<vmem>>, vector<128x2xf32>
      %23 = vector.broadcast %21 : vector<1x2xf32> to vector<128x2xf32>
      %24 = arith.addf %22, %23 : vector<128x2xf32>
      %cst_14 = arith.constant dense<0xFF800000> : vector<2xf32>
      %25 = vector.multi_reduction <maximumf>, %24, %cst_14 [0] : vector<128x2xf32> to vector<2xf32>
      %26 = vector.shape_cast %25 : vector<2xf32> to vector<1x2xf32>
      %27 = vector.broadcast %26 : vector<1x2xf32> to vector<128x2xf32>
      %28 = arith.subf %24, %27 : vector<128x2xf32>
      %29 = math.exp %28 : vector<128x2xf32>
      %cst_15 = arith.constant dense<0.000000e+00> : vector<2xf32>
      %30 = vector.multi_reduction <add>, %29, %cst_15 [0] : vector<128x2xf32> to vector<2xf32>
      %31 = vector.shape_cast %30 : vector<2xf32> to vector<1x2xf32>
      %32 = tpu.reciprocal %31 : vector<1x2xf32> -> vector<1x2xf32>
      %33 = vector.broadcast %32 : vector<1x2xf32> to vector<128x2xf32>
      %34 = arith.mulf %29, %33 : vector<128x2xf32>
      %c0_16 = arith.constant 0 : index
      %c0_17 = arith.constant 0 : index
      %35 = vector.load %arg6[%c0_16, %c0_17] : memref<128x2xf32, #tpu.memory_space<vmem>>, vector<128x2xf32>
      tpu.vector_store %arg6[%c0_16, %c0_17], %34 {strides = array<i32>} : memref<128x2xf32, #tpu.memory_space<vmem>>, vector<128x2xf32>,
    } else {
    }
    return
  }
  func.func @transform_0(%arg0: i32) -> (i32, i32) {
    %c0_i32 = arith.constant 0 : i32
    %c0_i32_0 = arith.constant 0 : i32
    %c0_i32_1 = arith.constant 0 : i32
    return %c0_i32, %c0_i32_0 : i32, i32
  }
  func.func @transform_1(%arg0: i32) -> (i32, i32, i32) {
    %c0_i32 = arith.constant 0 : i32
    %c0_i32_0 = arith.constant 0 : i32
    %c0_i32_1 = arith.constant 0 : i32
    return %arg0, %c0_i32, %c0_i32_0 : i32, i32, i32
  }
  func.func @transform_2(%arg0: i32) -> (i32, i32) {
    %c0_i32 = arith.constant 0 : i32
    %c0_i32_0 = arith.constant 0 : i32
    %c0_i32_1 = arith.constant 0 : i32
    return %c0_i32, %c0_i32_0 : i32, i32
  }
  func.func @transform_3(%arg0: i32) -> (i32, i32) {
    %c0_i32 = arith.constant 0 : i32
    %c0_i32_0 = arith.constant 0 : i32
    %c0_i32_1 = arith.constant 0 : i32
    return %c0_i32, %c0_i32_0 : i32, i32
  }
  func.func @transform_4(%arg0: i32) -> (i32, i32) {
    %c0_i32 = arith.constant 0 : i32
    %c0_i32_0 = arith.constant 0 : i32
    %c0_i32_1 = arith.constant 0 : i32
    return %c0_i32, %c0_i32_0 : i32, i32
  }
  func.func @transform_5(%arg0: i32) -> (i32, i32) {
    %c0_i32 = arith.constant 0 : i32
    %c0_i32_0 = arith.constant 0 : i32
    %c0_i32_1 = arith.constant 0 : i32
    return %c0_i32, %c0_i32_0 : i32, i32
  }
}

</mosaic_0001>

<bundles_post_ra>
// kernel: tpu_custom_call.1
= control target key start
LH: loop header
LB: loop body
LE: loop exit
PB: predicated region body
PF: predicated region fallthrough
CT: control target
= control target key end

     0   :  { %s1005_s20 = smov 0   ;;  %s1453_s0 = inlined_call_operand.vmem [shape: f32[64,2], index: 0, kind: input, shape index: {}]   ;;  %s1454_s1 = inlined_call_operand.vmem [shape: f32[128,2,64], index: 1, kind: input, shape index: {}]   ;;  %s1455_s2 = inlined_call_operand.vmem [shape: f32[64,1], index: 2, kind: input, shape index: {}]   ;;  %s1456_s3 = inlined_call_operand.vmem [shape: f32[1,64], index: 3, kind: input, shape index: {}]   ;;  %s1457_s4 = inlined_call_operand.<no memory space> [shape: f32[1,1], index: 4, kind: input, shape index: {}]   ;;  %s1458_s5 = inlined_call_operand.vmem [shape: f32[128,2], index: 5, kind: output, shape index: {}]  }
   0x1   :  { %v10_v0 = vstv %s1457_s4 }
   0x2   :  { %11 = vst [vmem:[#allocation3] sm:$0x1] %v10_v0 }
   0x3 LB: > { %s907_s21 = sadd.s32 4294967295, %s969_s20   ;;  %p910_p0 = scmp.ge.s32.totalorder %s969_s20, 1  ;;  %s969_s20 = sphi %s1005_s20, %s17_s20  }
   0x4   : > { %p185_p1 = scmp.lt.s32.totalorder %s969_s20, 5 }
   0x6   : > { %p186_p2 = pnand %p910_p0, %p185_p1 }
   0x7   : > { %s1015_s22 = sshll.u32 (!%p186_p2), %s907_s21, 5  ;;  %v1022_v1 = vld [vmem:[%s1456_s3] ss:$0 sm:$0xff] (!%p186_p2)  ;;  %vm285_vm0 = vcmask (!%p186_p2), 517120   ;;  %vm545_vm1 = vcmask (!%p186_p2), 1041409   ;;  %vm547_vm2 = vcmask (!%p186_p2), 1042434  }
   0x8   : > { %189 = sbr.rel (%p186_p2) target bundleno = 494 (0x1ee), region = 40  ;;  %p209_p3 = scmp.lt.s32.totalorder (!%p186_p2), %s1015_s22, 127  ;;  %vm549_vm3 = vcmask (!%p186_p2), 1043459   ;;  %vm551_vm4 = vcmask (!%p186_p2), 1044484   ;;  %vm553_vm5 = vcmask (!%p186_p2), 1045509   ;;  %vm555_vm6 = vcmask (!%p186_p2), 1046534  }
   0x9   : > { %vm557_vm7 = vcmask (!%p186_p2), 1047559   ;;  %vm585_vm8 = vcmask (!%p186_p2), 15360   ;;  %s584_s29 = scalar_lea.vmem (!%p186_p2), [#allocation2], %s1015_s22  ;;  %p915_p4 = scmp.ne.s32.totalorder (!%p186_p2), %s907_s21, 3 }
   0xf   : > { %s210_s4 = scalar_select %p209_p3, %s1015_s22, 127 }
  0x11   : > { %s912_s23 = sshll.u32 %s210_s4, 1 }
  0x12   : > { %s1027_s28 = scalar_lea.vmem %s1454_s1, %s912_s23 }
  0x13   : > { %v222_v2 = vld [vmem:[%s1027_s28 + $0x10] sm:$0x3]  ;;  %v214_v3 = vld [vmem:[%s1027_s28] sm:$0x3]  ;;  %v223_v4 = vld [vmem:[%s1027_s28 + $0x12] sm:$0x3] }
  0x14   : > { %v261_v5 = vmul.f32 %v1022_v1, %v222_v2  ;;  %v253_v6 = vmul.f32 %v1022_v1, %v214_v3  ;;  %v262_v7 = vmul.f32 %v1022_v1, %v223_v4  ;;  %v215_v8 = vld [vmem:[%s1027_s28 + $0x2] sm:$0x3]  ;;  %v230_v11 = vld [vmem:[%s1027_s28 + $0x20] sm:$0x3]  ;;  %v239_v18 = vld [vmem:[%s1027_s28 + $0x32] sm:$0x3] }
  0x15   : > { %v254_v9 = vmul.f32 %v1022_v1, %v215_v8  ;;  %v231_v10 = vld [vmem:[%s1027_s28 + $0x22] sm:$0x3]  ;;  %v269_v17 = vmul.f32 %v1022_v1, %v230_v11  ;;  %v238_v19 = vld [vmem:[%s1027_s28 + $0x30] sm:$0x3]  ;;  %v278_v22 = vmul.f32 %v1022_v1, %v239_v18  ;;  %v224_v24 = vld [vmem:[%s1027_s28 + $0x14] sm:$0x3] }
  0x16   : > { %v310_v12 = vsel %vm285_vm0, %v261_v5, 0.0  ;;  %v286_v13 = vsel %vm285_vm0, %v253_v6, 0.0  ;;  %v313_v14 = vsel %vm285_vm0, %v262_v7, 0.0  ;;  %v270_v16 = vmul.f32 %v1022_v1, %v231_v10  ;;  %v216_v25 = vld [vmem:[%s1027_s28 + $0x4] sm:$0x3] }
  0x17   : > { %311 = vadd.xlane.f32.xlu1 %v310_v12  ;;  %287 = vadd.xlane.f32.xlu0 %v286_v13  ;;  %v289_v15 = vsel %vm285_vm0, %v254_v9, 0.0  ;;  %v334_v21 = vsel %vm285_vm0, %v269_v17, 0.0  ;;  %v277_v23 = vmul.f32 %v1022_v1, %v238_v19  ;;  %v361_v26 = vsel %vm285_vm0, %v278_v22, 0.0  ;;  %v240_v30 = vld [vmem:[%s1027_s28 + $0x34] sm:$0x3] }
  0x18   : > { %v337_v20 = vsel %vm285_vm0, %v270_v16, 0.0  ;;  %v263_v28 = vmul.f32 %v1022_v1, %v224_v24  ;;  %v255_v29 = vmul.f32 %v1022_v1, %v216_v25  ;;  %v232_v31 = vld [vmem:[%s1027_s28 + $0x24] sm:$0x3]  ;;  %v279_v34 = vmul.f32 %v1022_v1, %v240_v30  ;;  %v225_v36 = vld [vmem:[%s1027_s28 + $0x16] sm:$0x3] }
  0x19   : > { %v358_v27 = vsel %vm285_vm0, %v277_v23, 0.0  ;;  %v271_v35 = vmul.f32 %v1022_v1, %v232_v31  ;;  %v217_v37 = vld [vmem:[%s1027_s28 + $0x6] sm:$0x3]  ;;  %v264_v40 = vmul.f32 %v1022_v1, %v225_v36  ;;  %v241_v42 = vld [vmem:[%s1027_s28 + $0x36] sm:$0x3] }
  0x1a   : > { %v316_v32 = vsel %vm285_vm0, %v263_v28, 0.0  ;;  %v292_v33 = vsel %vm285_vm0, %v255_v29, 0.0  ;;  %v364_v38 = vsel %vm285_vm0, %v279_v34, 0.0  ;;  %v256_v41 = vmul.f32 %v1022_v1, %v217_v37  ;;  %v233_v43 = vld [vmem:[%s1027_s28 + $0x26] sm:$0x3] }
  0x1b   : > { %314 = vadd.xlane.f32.xlu1 %v313_v14  ;;  %290 = vadd.xlane.f32.xlu0 %v289_v15  ;;  %v340_v39 = vsel %vm285_vm0, %v271_v35, 0.0  ;;  %v319_v44 = vsel %vm285_vm0, %v264_v40, 0.0  ;;  %v280_v46 = vmul.f32 %v1022_v1, %v241_v42  ;;  %v272_v47 = vmul.f32 %v1022_v1, %v233_v43  ;;  %v226_v48 = vld [vmem:[%s1027_s28 + $0x18] sm:$0x3]  ;;  %v218_v49 = vld [vmem:[%s1027_s28 + $0x8] sm:$0x3] }
  0x1c   : > { %v295_v45 = vsel %vm285_vm0, %v256_v41, 0.0  ;;  %v265_v52 = vmul.f32 %v1022_v1, %v226_v48  ;;  %v257_v53 = vmul.f32 %v1022_v1, %v218_v49  ;;  %v242_v54 = vld [vmem:[%s1027_s28 + $0x38] sm:$0x3]  ;;  %v234_v55 = vld [vmem:[%s1027_s28 + $0x28] sm:$0x3] }
  0x1d   : > { %v367_v50 = vsel %vm285_vm0, %v280_v46, 0.0  ;;  %v343_v51 = vsel %vm285_vm0, %v272_v47, 0.0  ;;  %v281_v58 = vmul.f32 %v1022_v1, %v242_v54  ;;  %v273_v59 = vmul.f32 %v1022_v1, %v234_v55  ;;  %v227_v60 = vld [vmem:[%s1027_s28 + $0x1a] sm:$0x3]  ;;  %v219_v61 = vld [vmem:[%s1027_s28 + $0xa] sm:$0x3] }
  0x1e   : > { %v322_v56 = vsel %vm285_vm0, %v265_v52, 0.0  ;;  %v298_v57 = vsel %vm285_vm0, %v257_v53, 0.0  ;;  %v266_v0 = vmul.f32 %v1022_v1, %v227_v60  ;;  %v258_v2 = vmul.f32 %v1022_v1, %v219_v61  ;;  %v243_v3 = vld [vmem:[%s1027_s28 + $0x3a] sm:$0x3]  ;;  %v235_v4 = vld [vmem:[%s1027_s28 + $0x2a] sm:$0x3] }
  0x1f   : > { %338 = vadd.xlane.f32.xlu1 %v337_v20  ;;  %335 = vadd.xlane.f32.xlu0 %v334_v21  ;;  %v370_v62 = vsel %vm285_vm0, %v281_v58, 0.0  ;;  %v346_v63 = vsel %vm285_vm0, %v273_v59, 0.0  ;;  %v282_v7 = vmul.f32 %v1022_v1, %v243_v3  ;;  %v274_v8 = vmul.f32 %v1022_v1, %v235_v4  ;;  %v228_v9 = vld [vmem:[%s1027_s28 + $0x1c] sm:$0x3]  ;;  %v220_v10 = vld [vmem:[%s1027_s28 + $0xc] sm:$0x3] }
  0x20   : > { %v325_v5 = vsel %vm285_vm0, %v266_v0, 0.0  ;;  %v301_v6 = vsel %vm285_vm0, %v258_v2, 0.0  ;;  %v267_v13 = vmul.f32 %v1022_v1, %v228_v9  ;;  %v259_v14 = vmul.f32 %v1022_v1, %v220_v10  ;;  %v244_v15 = vld [vmem:[%s1027_s28 + $0x3c] sm:$0x3]  ;;  %v236_v16 = vld [vmem:[%s1027_s28 + $0x2c] sm:$0x3] }
  0x21   : > { %v373_v11 = vsel %vm285_vm0, %v282_v7, 0.0  ;;  %v349_v12 = vsel %vm285_vm0, %v274_v8, 0.0  ;;  %v283_v19 = vmul.f32 %v1022_v1, %v244_v15  ;;  %v275_v20 = vmul.f32 %v1022_v1, %v236_v16  ;;  %v229_v21 = vld [vmem:[%s1027_s28 + $0x1e] sm:$0x3]  ;;  %v221_v22 = vld [vmem:[%s1027_s28 + $0xe] sm:$0x3] }
  0x22   : > { %v328_v17 = vsel %vm285_vm0, %v267_v13, 0.0  ;;  %v304_v18 = vsel %vm285_vm0, %v259_v14, 0.0  ;;  %v268_v25 = vmul.f32 %v1022_v1, %v229_v21  ;;  %v237_v28 = vld [vmem:[%s1027_s28 + $0x2e] sm:$0x3]  ;;  %v415_v52 = vlaneseq }
  0x23   : > { %362 = vadd.xlane.f32.xlu1 %v361_v26  ;;  %359 = vadd.xlane.f32.xlu0 %v358_v27  ;;  %v376_v23 = vsel %vm285_vm0, %v283_v19, 0.0  ;;  %v352_v24 = vsel %vm285_vm0, %v275_v20, 0.0  ;;  %v260_v26 = vmul.f32 %v1022_v1, %v221_v22  ;;  %v245_v27 = vld [vmem:[%s1027_s28 + $0x3e] sm:$0x3] }
  0x24   : > { %v331_v29 = vsel %vm285_vm0, %v268_v25, 0.0  ;;  %v284_v31 = vmul.f32 %v1022_v1, %v245_v27  ;;  %v416_v55 = vand.u32 127, %v415_v52 }
  0x25   : > { %v307_v30 = vsel %vm285_vm0, %v260_v26, 0.0 }
  0x27   : > { %317 = vadd.xlane.f32.xlu1 %v316_v32  ;;  %293 = vadd.xlane.f32.xlu0 %v292_v33  ;;  %v276_v32 = vmul.f32 %v1022_v1, %v237_v28  ;;  %v379_v33 = vsel %vm285_vm0, %v284_v31, 0.0 }
  0x29   : > { %v355_v34 = vsel %vm285_vm0, %v276_v32, 0.0 }
  0x2b   : > { %365 = vadd.xlane.f32.xlu1 %v364_v38  ;;  %341 = vadd.xlane.f32.xlu0 %v340_v39 }
  0x2f   : > { %320 = vadd.xlane.f32.xlu1 %v319_v44  ;;  %296 = vadd.xlane.f32.xlu0 %v295_v45 }
  0x33   : > { %368 = vadd.xlane.f32.xlu1 %v367_v50  ;;  %344 = vadd.xlane.f32.xlu0 %v343_v51 }
  0x37   : > { %323 = vadd.xlane.f32.xlu1 %v322_v56  ;;  %299 = vadd.xlane.f32.xlu0 %v298_v57  ;;  %v1133_v56 = vshrl.u32 %v415_v52, 7 }
  0x39   : > { %v1136_v59 = vsub.s32 %v416_v55, %v1133_v56 }
  0x3b   : > { %371 = vadd.xlane.f32.xlu1 %v370_v62  ;;  %347 = vadd.xlane.f32.xlu0 %v346_v63 }
  0x3f   : > { %326 = vadd.xlane.f32.xlu1 %v325_v5  ;;  %302 = vadd.xlane.f32.xlu0 %v301_v6 }
  0x43   : > { %374 = vadd.xlane.f32.xlu1 %v373_v11  ;;  %350 = vadd.xlane.f32.xlu0 %v349_v12 }
  0x47   : > { %329 = vadd.xlane.f32.xlu1 %v328_v17  ;;  %305 = vadd.xlane.f32.xlu0 %v304_v18 }
  0x4b   : > { %377 = vadd.xlane.f32.xlu1 %v376_v23  ;;  %353 = vadd.xlane.f32.xlu0 %v352_v24 }
  0x4f   : > { %332 = vadd.xlane.f32.xlu1 %v331_v29  ;;  %308 = vadd.xlane.f32.xlu0 %v307_v30 }
  0x53   : > { %380 = vadd.xlane.f32.xlu1 %v379_v33  ;;  %356 = vadd.xlane.f32.xlu0 %v355_v34 }
  0xa4   : > { %v312_v35 = vpop.xlane.xlu1 %311  ;;  %v288_v36 = vpop.xlane.xlu0 %287 }
  0xa5   : > { %v452_v62 = vrot.slane %v312_v35, %v1136_v59  ;;  %v420_v63 = vrot.slane %v288_v36, %v1136_v59 }
  0xa8   : > { %v315_v37 = vpop.xlane.xlu1 %314  ;;  %v291_v38 = vpop.xlane.xlu0 %290 }
  0xa9   : > { %v456_v0 = vrot.slane %v315_v37, %v1136_v59  ;;  %v424_v2 = vrot.slane %v291_v38, %v1136_v59 }
  0xab   : > { %v559_v15 = vsel %vm545_vm1, %v456_v0, %v452_v62  ;;  %v546_v16 = vsel %vm545_vm1, %v424_v2, %v420_v63 }
  0xac   : > { %v339_v39 = vpop.xlane.xlu1 %338  ;;  %v336_v40 = vpop.xlane.xlu0 %335 }
  0xad   : > { %v488_v3 = vrot.slane %v339_v39, %v1136_v59  ;;  %v484_v4 = vrot.slane %v336_v40, %v1136_v59 }
  0xaf   : > { %v566_v19 = vsel %vm545_vm1, %v488_v3, %v484_v4 }
  0xb0   : > { %v363_v41 = vpop.xlane.xlu1 %362  ;;  %v360_v42 = vpop.xlane.xlu0 %359 }
  0xb1   : > { %v520_v5 = vrot.slane %v363_v41, %v1136_v59  ;;  %v516_v6 = vrot.slane %v360_v42, %v1136_v59 }
  0xb3   : > { %v573_v20 = vsel %vm545_vm1, %v520_v5, %v516_v6  ;;  %v602_v5 = vld [vmem:[%s1455_s2] sm:$0xff] (!%p915_p4)  ;;  %v971_v6 = vmov (!%p915_p4), 0  }
  0xb4   : > { %v318_v43 = vpop.xlane.xlu1 %317  ;;  %v294_v44 = vpop.xlane.xlu0 %293  ;;  %928 = vset.pattern.permute.xlu1 (!%p915_p4), %v971_v6  ;;  %927 = vset.pattern.permute.xlu0 (!%p915_p4), %v971_v6 }
  0xb5   : > { %v460_v9 = vrot.slane %v318_v43, %v1136_v59  ;;  %v428_v10 = vrot.slane %v294_v44, %v1136_v59  ;;  %612 = vperm.xlu0 (!%p915_p4), %927, %v602_v5  }
  0xb7   : > { %v560_v25 = vsel %vm547_vm2, %v460_v9, %v559_v15  ;;  %v548_v26 = vsel %vm547_vm2, %v428_v10, %v546_v16  ;;  %v607_v9 = vld [vmem:[%s1455_s2 + $0x28] sm:$0xff] (!%p915_p4)  ;;  %v606_v10 = vld [vmem:[%s1455_s2 + $0x20] sm:$0xff] (!%p915_p4) }
  0xb8   : > { %v366_v45 = vpop.xlane.xlu1 %365  ;;  %v342_v1 = vpop.xlane.xlu0 %341  ;;  %v594_v16 = vld [vmem:[%s1453_s0] sm:$0xff] (!%p915_p4) }
  0xb9   : > { %v524_v11 = vrot.slane %v366_v45, %v1136_v59  ;;  %v492_v12 = vrot.slane %v342_v1, %v1136_v59 }
  0xbb   : > { %v574_v27 = vsel %vm547_vm2, %v524_v11, %v573_v20  ;;  %v567_v28 = vsel %vm547_vm2, %v492_v12, %v566_v19  ;;  %v609_v11 = vld [vmem:[%s1455_s2 + $0x38] sm:$0xff] (!%p915_p4)  ;;  %v608_v12 = vld [vmem:[%s1455_s2 + $0x30] sm:$0xff] (!%p915_p4) }
  0xbc   : > { %v321_v46 = vpop.xlane.xlu1 %320  ;;  %v297_v47 = vpop.xlane.xlu0 %296 }
  0xbd   : > { %v464_v13 = vrot.slane %v321_v46, %v1136_v59  ;;  %v432_v14 = vrot.slane %v297_v47, %v1136_v59 }
  0xbf   : > { %v561_v29 = vsel %vm549_vm3, %v464_v13, %v560_v25  ;;  %v550_v30 = vsel %vm549_vm3, %v432_v14, %v548_v26  ;;  %v679_v13 = vld [vmem:[#allocation3] sm:$0x1] (!%p915_p4) }
  0xc0   : > { %v1125_v48 = vpop.xlane.xlu1 %368  ;;  %v1127_v49 = vpop.xlane.xlu0 %344  ;;  %v598_v25 = vld [vmem:[%s1453_s0 + $0x20] sm:$0xff] (!%p915_p4) }
  0xc1   : > { %v528_v33 = vrot.slane %v1125_v48, %v1136_v59  ;;  %v496_v34 = vrot.slane %v1127_v49, %v1136_v59 }
  0xc4   : > { %v324_v50 = vpop.xlane.xlu1 %323  ;;  %v300_v51 = vpop.xlane.xlu0 %299 }
  0xc5   : > { %v468_v17 = vrot.slane %v324_v50, %v1136_v59  ;;  %v436_v18 = vrot.slane %v300_v51, %v1136_v59  ;;  %v575_v50 = vsel %vm549_vm3, %v528_v33, %v574_v27  ;;  %v568_v51 = vsel %vm549_vm3, %v496_v34, %v567_v28 }
  0xc7   : > { %v562_v35 = vsel %vm551_vm4, %v468_v17, %v561_v29  ;;  %v552_v36 = vsel %vm551_vm4, %v436_v18, %v550_v30  ;;  %v596_v17 = vld [vmem:[%s1453_s0 + $0x10] sm:$0xff] (!%p915_p4)  ;;  %v595_v18 = vld [vmem:[%s1453_s0 + $0x8] sm:$0xff] (!%p915_p4) }
  0xc8   : > { %v1129_v53 = vpop.xlane.xlu1 %371  ;;  %v1131_v54 = vpop.xlane.xlu0 %347 }
  0xc9   : > { %v532_v37 = vrot.slane %v1129_v53, %v1136_v59  ;;  %v500_v38 = vrot.slane %v1131_v54, %v1136_v59 }
  0xcb   : > { %v576_v54 = vsel %vm551_vm4, %v532_v37, %v575_v50  ;;  %v569_v55 = vsel %vm551_vm4, %v500_v38, %v568_v51 }
  0xcc   : > { %v327_v57 = vpop.xlane.xlu1 %326  ;;  %v303_v58 = vpop.xlane.xlu0 %302 }
  0xcd   : > { %v472_v21 = vrot.slane %v327_v57, %v1136_v59  ;;  %v440_v22 = vrot.slane %v303_v58, %v1136_v59 }
  0xcf   : > { %v563_v39 = vsel %vm553_vm5, %v472_v21, %v562_v35  ;;  %v554_v40 = vsel %vm553_vm5, %v440_v22, %v552_v36  ;;  %v597_v21 = vld [vmem:[%s1453_s0 + $0x18] sm:$0xff] (!%p915_p4)  ;;  %v600_v36 = vld [vmem:[%s1453_s0 + $0x30] sm:$0xff] (!%p915_p4) }
  0xd0   : > { %v1138_v60 = vpop.xlane.xlu1 %374  ;;  %v1140_v61 = vpop.xlane.xlu0 %350 }
  0xd1   : > { %v536_v43 = vrot.slane %v1138_v60, %v1136_v59  ;;  %v504_v44 = vrot.slane %v1140_v61, %v1136_v59 }
  0xd3   : > { %v577_v60 = vsel %vm553_vm5, %v536_v43, %v576_v54  ;;  %v570_v61 = vsel %vm553_vm5, %v504_v44, %v569_v55  ;;  %v687_v55 = vsub.s32 (!%p915_p4), 0, %v1133_v56 }
  0xd4   : > { %v330_v7 = vpop.xlane.xlu1 %329  ;;  %v306_v8 = vpop.xlane.xlu0 %305 }
  0xd5   : > { %v476_v31 = vrot.slane %v330_v7, %v1136_v59  ;;  %v444_v32 = vrot.slane %v306_v8, %v1136_v59  ;;  %v605_v7 = vld [vmem:[%s1455_s2 + $0x18] sm:$0xff] (!%p915_p4)  ;;  %v603_v8 = vld [vmem:[%s1455_s2 + $0x8] sm:$0xff] (!%p915_p4) }
  0xd6   : > { %617 = vperm.xlu0 (!%p915_p4), %927, %v603_v8  }
  0xd7   : > { %v564_v46 = vsel %vm555_vm6, %v476_v31, %v563_v39  ;;  %v556_v47 = vsel %vm555_vm6, %v444_v32, %v554_v40  ;;  %v599_v31 = vld [vmem:[%s1453_s0 + $0x28] sm:$0xff] (!%p915_p4) }
  0xd8   : > { %v378_v23 = vpop.xlane.xlu1 %377  ;;  %v354_v24 = vpop.xlane.xlu0 %353 }
  0xd9   : > { %v540_v48 = vrot.slane %v378_v23, %v1136_v59  ;;  %v508_v49 = vrot.slane %v354_v24, %v1136_v59 }
  0xda   : > { %632 = vperm.xlu0 (!%p915_p4), %927, %v606_v10  }
  0xdb   : > { %v578_v0 = vsel %vm555_vm6, %v540_v48, %v577_v60  ;;  %v571_v2 = vsel %vm555_vm6, %v508_v49, %v570_v61 }
  0xdc   : > { %v333_v41 = vpop.xlane.xlu1 %332  ;;  %v309_v42 = vpop.xlane.xlu0 %308 }
  0xdd   : > { %v480_v45 = vrot.slane %v333_v41, %v1136_v59  ;;  %v448_v1 = vrot.slane %v309_v42, %v1136_v59  ;;  %v601_v41 = vld [vmem:[%s1453_s0 + $0x38] sm:$0xff] (!%p915_p4) }
  0xde   : > { %593 = sbr.rel (%p915_p4) target bundleno = 494 (0x1ee), region = 44  ;;  %642 = vperm.xlu0 (!%p915_p4), %927, %v608_v12  }
  0xdf   : > { %v565_v52 = vsel %vm557_vm7, %v480_v45, %v564_v46  ;;  %v558_v53 = vsel %vm557_vm7, %v448_v1, %v556_v47 }
  0xe0   : > { %587 = vst.msk [vmem:[%s584_s29 + $0x8] sm:$0xff] %vm585_vm8, %v565_v52  ;;  %586 = vst.msk [vmem:[%s584_s29] sm:$0xff] %vm585_vm8, %v558_v53  ;;  %v381_v57 = vpop.xlane.xlu1 %380  ;;  %v357_v58 = vpop.xlane.xlu0 %356 }
  0xe1   : > { %v544_v62 = vrot.slane %v381_v57, %v1136_v59  ;;  %v512_v63 = vrot.slane %v357_v58, %v1136_v59  ;;  %v604_v59 = vld [vmem:[%s1455_s2 + $0x10] sm:$0xff] (!%p915_p4) }
  0xe2   : > { %622 = vperm.xlu1 (!%p915_p4), %928, %v604_v59   ;;  %682 = vperm.xlu0 (!%p915_p4), %927, %v679_v13  }
  0xe3   : > { %v579_v3 = vsel %vm557_vm7, %v544_v62, %v578_v0  ;;  %v572_v4 = vsel %vm557_vm7, %v512_v63, %v571_v2 }
  0xe4   : > { %589 = vst.msk [vmem:[%s584_s29 + $0x18] sm:$0xff] %vm585_vm8, %v579_v3  ;;  %588 = vst.msk [vmem:[%s584_s29 + $0x10] sm:$0xff] %vm585_vm8, %v572_v4 }
  0xe6   : > { %627 = vperm.xlu1 %928, %v605_v7  }
  0xea   : > { %637 = vperm.xlu1 %928, %v607_v9  }
  0xeb   : > { %v690_v61 = vld [vmem:[#allocation2] sm:$0xff]  ;;  %v691_v62 = vld [vmem:[#allocation2 + $0x8] sm:$0xff]  ;;  %v692_v63 = vld [vmem:[#allocation2 + $0x10] sm:$0xff] }
  0xec   : > { %v693_v0 = vld [vmem:[#allocation2 + $0x18] sm:$0xff]  ;;  %v694_v4 = vld [vmem:[#allocation2 + $0x20] sm:$0xff]  ;;  %v695_v59 = vld [vmem:[#allocation2 + $0x28] sm:$0xff] }
  0xed   : > { %v696_v5 = vld [vmem:[#allocation2 + $0x30] sm:$0xff]  ;;  %v697_v6 = vld [vmem:[#allocation2 + $0x38] sm:$0xff]  ;;  %v698_v7 = vld [vmem:[#allocation2 + $0x40] sm:$0xff] }
  0xee   : > { %647 = vperm.xlu1 %928, %v609_v11   ;;  %v699_v8 = vld [vmem:[#allocation2 + $0x48] sm:$0xff]  ;;  %v700_v10 = vld [vmem:[#allocation2 + $0x50] sm:$0xff]  ;;  %v701_v11 = vld [vmem:[#allocation2 + $0x58] sm:$0xff] }
  0xef   : > { %v702_v12 = vld [vmem:[#allocation2 + $0x60] sm:$0xff]  ;;  %v703_v56 = vld [vmem:[#allocation2 + $0x68] sm:$0xff]  ;;  %v704_v13 = vld [vmem:[#allocation2 + $0x70] sm:$0xff] }
 0x134   : > { %v613_v15 = vpop.permute.xlu0 %612 }
 0x135   : > { %v650_v19 = vmul.f32 %v613_v15, %v594_v16 }
 0x137   : > { %v658_v26 = vsel %vm585_vm8, %v650_v19, 0.0 }
 0x155   : > { %v618_v22 = vpop.permute.xlu0 %617 }
 0x156   : > { %v651_v24 = vmul.f32 %v618_v22, %v595_v18 }
 0x158   : > { %v659_v28 = vsel %vm585_vm8, %v651_v24, 0.0 }
 0x159   : > { %v660_v29 = vadd.f32 %v659_v28, %v658_v26  ;;  %v633_v32 = vpop.permute.xlu0 %632 }
 0x15a   : > { %v654_v34 = vmul.f32 %v633_v32, %v598_v25 }
 0x15c   : > { %v665_v43 = vsel %vm585_vm8, %v654_v34, 0.0 }
 0x15d   : > { %v643_v42 = vpop.permute.xlu0 %642 }
 0x15e   : > { %v656_v44 = vmul.f32 %v643_v42, %v600_v36 }
 0x160   : > { %v669_v48 = vsel %vm585_vm8, %v656_v44, 0.0 }
 0x161   : > { %v623_v14 = vpop.permute.xlu1 %622  ;;  %v683_v58 = vpop.permute.xlu0 %682 }
 0x162   : > { %v652_v23 = vmul.f32 %v623_v14, %v596_v17  ;;  %v688_v3 = vrot.slane %v683_v58, %v687_v55  ;;  %v705_v14 = vld [vmem:[#allocation2 + $0x78] sm:$0xff] }
 0x164   : > { %v661_v33 = vsel %vm585_vm8, %v652_v23, 0.0 }
 0x165   : > { %v628_v20 = vpop.permute.xlu1 %627  ;;  %v662_v35 = vadd.f32 %v661_v33, %v660_v29 }
 0x166   : > { %v653_v27 = vmul.f32 %v628_v20, %v597_v21 }
 0x168   : > { %v663_v37 = vsel %vm585_vm8, %v653_v27, 0.0 }
 0x169   : > { %v638_v30 = vpop.permute.xlu1 %637  ;;  %v664_v39 = vadd.f32 %v663_v37, %v662_v35 }
 0x16a   : > { %v655_v38 = vmul.f32 %v638_v30, %v599_v31 }
 0x16b   : > { %v666_v45 = vadd.f32 %v665_v43, %v664_v39 }
 0x16c   : > { %v667_v1 = vsel %vm585_vm8, %v655_v38, 0.0 }
 0x16d   : > { %v648_v40 = vpop.permute.xlu1 %647  ;;  %v668_v47 = vadd.f32 %v667_v1, %v666_v45 }
 0x16e   : > { %v657_v46 = vmul.f32 %v648_v40, %v601_v41 }
 0x16f   : > { %v670_v49 = vadd.f32 %v669_v48, %v668_v47 }
 0x170   : > { %v671_v50 = vsel %vm585_vm8, %v657_v46, 0.0 }
 0x171   : > { %v672_v51 = vadd.f32 %v671_v50, %v670_v49 }
 0x173   : > { %v673_v52 = vrot.slane %v672_v51, 4 }
 0x175   : > { %v674_v53 = vadd.f32 %v673_v52, %v672_v51 }
 0x177   : > { %v675_v54 = vrot.slane %v674_v53, 2 }
 0x179   : > { %v676_v57 = vadd.f32 %v675_v54, %v674_v53 }
 0x17b   : > { %v677_v60 = vrot.slane %v676_v57, 1 }
 0x17d   : > { %v678_v2 = vadd.f32 %v677_v60, %v676_v57 }
 0x17f   : > { %v689_v9 = vadd.f32 %v688_v3, %v678_v2 }
 0x181   : > { %v706_v15 = vadd.f32 %v690_v61, %v689_v9  ;;  %v707_v16 = vadd.f32 %v691_v62, %v689_v9  ;;  %v708_v17 = vadd.f32 %v692_v63, %v689_v9  ;;  %v709_v18 = vadd.f32 %v693_v0, %v689_v9 }
 0x182   : > { %v710_v19 = vadd.f32 %v694_v4, %v689_v9  ;;  %v1272_v20 = vadd.f32 %v695_v59, %v689_v9  ;;  %v1274_v21 = vadd.f32 %v696_v5, %v689_v9  ;;  %v1276_v22 = vadd.f32 %v697_v6, %v689_v9 }
 0x183   : > { %v1278_v23 = vadd.f32 %v698_v7, %v689_v9  ;;  %v1280_v24 = vadd.f32 %v699_v8, %v689_v9  ;;  %v1282_v25 = vadd.f32 %v700_v10, %v689_v9  ;;  %v1284_v26 = vadd.f32 %v701_v11, %v689_v9 }
 0x184   : > { %v1286_v27 = vadd.f32 %v702_v12, %v689_v9  ;;  %v1288_v28 = vadd.f32 %v703_v56, %v689_v9  ;;  %v1290_v29 = vadd.f32 %v704_v13, %v689_v9  ;;  %v1292_v30 = vadd.f32 %v705_v14, %v689_v9 }
 0x185   : > { %v722_v31 = vsel %vm585_vm8, %v706_v15, -inf  ;;  %v723_v32 = vsel %vm585_vm8, %v707_v16, -inf  ;;  %v724_v33 = vsel %vm585_vm8, %v708_v17, -inf  ;;  %v725_v34 = vsel %vm585_vm8, %v709_v18, -inf }
 0x186   : > { %v726_v35 = vsel %vm585_vm8, %v710_v19, -inf  ;;  %v728_v36 = vsel %vm585_vm8, %v1272_v20, -inf  ;;  %v730_v37 = vsel %vm585_vm8, %v1274_v21, -inf  ;;  %v732_v38 = vsel %vm585_vm8, %v1276_v22, -inf }
 0x187   : > { %v727_v39 = vmax.f32 %v722_v31, %v726_v35  ;;  %v729_v40 = vmax.f32 %v723_v32, %v728_v36  ;;  %v731_v41 = vmax.f32 %v724_v33, %v730_v37  ;;  %v733_v42 = vmax.f32 %v725_v34, %v732_v38 }
 0x188   : > { %v734_v43 = vsel %vm585_vm8, %v1278_v23, -inf  ;;  %v736_v44 = vsel %vm585_vm8, %v1280_v24, -inf  ;;  %v738_v45 = vsel %vm585_vm8, %v1282_v25, -inf  ;;  %v740_v1 = vsel %vm585_vm8, %v1284_v26, -inf }
 0x189   : > { %v735_v46 = vmax.f32 %v727_v39, %v734_v43  ;;  %v737_v47 = vmax.f32 %v729_v40, %v736_v44  ;;  %v739_v48 = vmax.f32 %v731_v41, %v738_v45  ;;  %v741_v49 = vmax.f32 %v733_v42, %v740_v1 }
 0x18a   : > { %v742_v50 = vsel %vm585_vm8, %v1286_v27, -inf  ;;  %v744_v51 = vsel %vm585_vm8, %v1288_v28, -inf  ;;  %v746_v52 = vsel %vm585_vm8, %v1290_v29, -inf  ;;  %v748_v53 = vsel %vm585_vm8, %v1292_v30, -inf }
 0x18b   : > { %v743_v54 = vmax.f32 %v735_v46, %v742_v50  ;;  %v745_v55 = vmax.f32 %v737_v47, %v744_v51  ;;  %v747_v57 = vmax.f32 %v739_v48, %v746_v52  ;;  %v749_v58 = vmax.f32 %v741_v49, %v748_v53 }
 0x18d   : > { %v750_v60 = vmax.f32 %v743_v54, %v745_v55  ;;  %v751_v61 = vmax.f32 %v747_v57, %v749_v58 }
 0x18f   : > { %v752_v62 = vmax.f32 %v750_v60, %v751_v61 }
 0x191   : > { %v753_v63 = vrot.slane %v752_v62, 4 }
 0x193   : > { %v754_v0 = vmax.f32 %v752_v62, %v753_v63 }
 0x195   : > { %v755_v2 = vrot.slane %v754_v0, 2 }
 0x197   : > { %v756_v3 = vmax.f32 %v754_v0, %v755_v2 }
 0x199   : > { %v757_v4 = vrot.slane %v756_v3, 1 }
 0x19b   : > { %v1321_v59 = vmax.f32 %v756_v3, %v757_v4 }
 0x19d   : > { %v759_v5 = vsub.f32 %v706_v15, %v1321_v59  ;;  %v760_v6 = vsub.f32 %v707_v16, %v1321_v59  ;;  %v761_v7 = vsub.f32 %v708_v17, %v1321_v59  ;;  %v762_v8 = vsub.f32 %v709_v18, %v1321_v59 }
 0x19e   : > { %v763_v9 = vsub.f32 %v710_v19, %v1321_v59  ;;  %v764_v56 = vsub.f32 %v1272_v20, %v1321_v59  ;;  %v765_v14 = vsub.f32 %v1274_v21, %v1321_v59  ;;  %v766_v16 = vsub.f32 %v1276_v22, %v1321_v59 }
 0x19f   : > { %v775_v10 = vmul.f32 1.442695, %v759_v5  ;;  %v777_v11 = vmul.f32 1.442695, %v760_v6  ;;  %v779_v12 = vmul.f32 1.442695, %v761_v7  ;;  %v767_v18 = vsub.f32 %v1278_v23, %v1321_v59 }
 0x1a0   : > { %v781_v13 = vmul.f32 1.442695, %v762_v8  ;;  %v783_v15 = vmul.f32 1.442695, %v763_v9  ;;  %v785_v17 = vmul.f32 1.442695, %v764_v56  ;;  %v768_v20 = vsub.f32 %v1280_v24, %v1321_v59 }
 0x1a1   : > { %929 = vpow2.f32 %v775_v10  ;;  %v787_v19 = vmul.f32 1.442695, %v765_v14  ;;  %v789_v31 = vmul.f32 1.442695, %v766_v16  ;;  %v769_v21 = vsub.f32 %v1282_v25, %v1321_v59 }
 0x1a2   : > { %931 = vpow2.f32 %v777_v11  ;;  %v791_v32 = vmul.f32 1.442695, %v767_v18  ;;  %v770_v34 = vsub.f32 %v1284_v26, %v1321_v59  ;;  %v793_v23 = vmul.f32 1.442695, %v768_v20 }
 0x1a3   : > { %933 = vpow2.f32 %v779_v12  ;;  %v771_v37 = vsub.f32 %v1286_v27, %v1321_v59  ;;  %v795_v38 = vmul.f32 1.442695, %v769_v21  ;;  %v772_v41 = vsub.f32 %v1288_v28, %v1321_v59 }
 0x1a4   : > { %935 = vpow2.f32 %v781_v13  ;;  %v797_v42 = vmul.f32 1.442695, %v770_v34  ;;  %v773_v27 = vsub.f32 %v1290_v29, %v1321_v59  ;;  %v774_v28 = vsub.f32 %v1292_v30, %v1321_v59 }
 0x1a5   : > { %937 = vpow2.f32 %v783_v15  ;;  %v799_v1 = vmul.f32 1.442695, %v771_v37  ;;  %v801_v49 = vmul.f32 1.442695, %v772_v41 }
 0x1a6   : > { %939 = vpow2.f32 %v785_v17  ;;  %v803_v53 = vmul.f32 1.442695, %v773_v27  ;;  %v805_v57 = vmul.f32 1.442695, %v774_v28 }
 0x1a7   : > { %941 = vpow2.f32 %v787_v19 }
 0x1a8   : > { %943 = vpow2.f32 %v789_v31 }
 0x1a9   : > { %945 = vpow2.f32 %v791_v32 }
 0x1aa   : > { %947 = vpow2.f32 %v793_v23 }
 0x1ab   : > { %v1340_v33 = vpop.eup %929  ;;  %949 = vpow2.f32 %v795_v38 }
 0x1ac   : > { %v1342_v22 = vpop.eup %931  ;;  %v807_v35 = vsel %vm585_vm8, %v1340_v33, 0.0  ;;  %951 = vpow2.f32 %v797_v42 }
 0x1ad   : > { %v1348_v24 = vpop.eup %933  ;;  %v808_v36 = vsel %vm585_vm8, %v1342_v22, 0.0  ;;  %953 = vpow2.f32 %v799_v1 }
 0x1ae   : > { %v1352_v25 = vpop.eup %935  ;;  %v809_v39 = vadd.f32 %v808_v36, %v807_v35  ;;  %v810_v26 = vsel %vm585_vm8, %v1348_v24, 0.0  ;;  %955 = vpow2.f32 %v801_v49 }
 0x1af   : > { %v1358_v40 = vpop.eup %937  ;;  %v812_v44 = vsel %vm585_vm8, %v1352_v25, 0.0  ;;  %957 = vpow2.f32 %v803_v53 }
 0x1b0   : > { %v811_v43 = vadd.f32 %v810_v26, %v809_v39  ;;  %v940_v45 = vpop.eup %939  ;;  %v814_v47 = vsel %vm585_vm8, %v1358_v40, 0.0  ;;  %959 = vpow2.f32 %v805_v57 }
 0x1b1   : > { %v942_v48 = vpop.eup %941  ;;  %v816_v51 = vsel %vm585_vm8, %v940_v45, 0.0 }
 0x1b2   : > { %v813_v46 = vadd.f32 %v812_v44, %v811_v43  ;;  %v944_v52 = vpop.eup %943  ;;  %v818_v29 = vsel %vm585_vm8, %v942_v48, 0.0 }
 0x1b3   : > { %v946_v55 = vpop.eup %945  ;;  %v820_v60 = vsel %vm585_vm8, %v944_v52, 0.0 }
 0x1b4   : > { %v815_v50 = vadd.f32 %v814_v47, %v813_v46  ;;  %v948_v61 = vpop.eup %947  ;;  %v822_v62 = vsel %vm585_vm8, %v946_v55, 0.0 }
 0x1b5   : > { %v950_v63 = vpop.eup %949  ;;  %v824_v2 = vsel %vm585_vm8, %v948_v61, 0.0 }
 0x1b6   : > { %v817_v54 = vadd.f32 %v816_v51, %v815_v50  ;;  %v952_v3 = vpop.eup %951  ;;  %v826_v59 = vsel %vm585_vm8, %v950_v63, 0.0 }
 0x1b7   : > { %v954_v5 = vpop.eup %953  ;;  %v828_v7 = vsel %vm585_vm8, %v952_v3, 0.0 }
 0x1b8   : > { %v819_v58 = vadd.f32 %v818_v29, %v817_v54  ;;  %v956_v8 = vpop.eup %955  ;;  %v830_v10 = vsel %vm585_vm8, %v954_v5, 0.0 }
 0x1b9   : > { %v958_v11 = vpop.eup %957  ;;  %v832_v56 = vsel %vm585_vm8, %v956_v8, 0.0 }
 0x1ba   : > { %v821_v30 = vadd.f32 %v820_v60, %v819_v58  ;;  %v960_v13 = vpop.eup %959  ;;  %v834_v15 = vsel %vm585_vm8, %v958_v11, 0.0 }
 0x1bb   : > { %v836_v17 = vsel %vm585_vm8, %v960_v13, 0.0 }
 0x1bc   : > { %v823_v0 = vadd.f32 %v822_v62, %v821_v30 }
 0x1be   : > { %v825_v4 = vadd.f32 %v824_v2, %v823_v0 }
 0x1c0   : > { %v827_v6 = vadd.f32 %v826_v59, %v825_v4 }
 0x1c2   : > { %v829_v9 = vadd.f32 %v828_v7, %v827_v6 }
 0x1c4   : > { %v831_v12 = vadd.f32 %v830_v10, %v829_v9 }
 0x1c6   : > { %v833_v14 = vadd.f32 %v832_v56, %v831_v12 }
 0x1c8   : > { %v835_v16 = vadd.f32 %v834_v15, %v833_v14 }
 0x1ca   : > { %v837_v18 = vadd.f32 %v836_v17, %v835_v16 }
 0x1cc   : > { %v838_v19 = vrot.slane %v837_v18, 4 }
 0x1ce   : > { %v839_v20 = vadd.f32 %v838_v19, %v837_v18 }
 0x1d0   : > { %v840_v31 = vrot.slane %v839_v20, 2 }
 0x1d2   : > { %v841_v21 = vadd.f32 %v840_v31, %v839_v20 }
 0x1d4   : > { %v842_v32 = vrot.slane %v841_v21, 1 }
 0x1d6   : > { %v843_v34 = vadd.f32 %v842_v32, %v841_v21 }
 0x1d8   : > { %961 = vrcp.f32 %v843_v34 }
 0x1e2   : > { %v962_v23 = vpop.eup %961 }
 0x1e3   : > { %v845_v35 = vmul.f32 %v962_v23, %v1340_v33  ;;  %v846_v36 = vmul.f32 %v962_v23, %v1342_v22  ;;  %v847_v37 = vmul.f32 %v962_v23, %v1348_v24  ;;  %v848_v38 = vmul.f32 %v962_v23, %v1352_v25 }
 0x1e4   : > { %v849_v39 = vmul.f32 %v962_v23, %v1358_v40  ;;  %v850_v26 = vmul.f32 %v962_v23, %v940_v45  ;;  %v851_v41 = vmul.f32 %v962_v23, %v942_v48  ;;  %v852_v42 = vmul.f32 %v962_v23, %v944_v52 }
 0x1e5   : > { %v853_v43 = vmul.f32 %v962_v23, %v946_v55  ;;  %v854_v44 = vmul.f32 %v962_v23, %v948_v61  ;;  %v855_v27 = vmul.f32 %v962_v23, %v950_v63  ;;  %v856_v1 = vmul.f32 %v962_v23, %v952_v3  ;;  %861 = vst.msk [vmem:[%s1458_s5] sm:$0xff] %vm585_vm8, %v845_v35 }
 0x1e6   : > { %862 = vst.msk [vmem:[%s1458_s5 + $0x8] sm:$0xff] %vm585_vm8, %v846_v36  ;;  %863 = vst.msk [vmem:[%s1458_s5 + $0x10] sm:$0xff] %vm585_vm8, %v847_v37  ;;  %v857_v33 = vmul.f32 %v962_v23, %v954_v5  ;;  %v858_v22 = vmul.f32 %v962_v23, %v956_v8  ;;  %v859_v24 = vmul.f32 %v962_v23, %v958_v11 }
 0x1e7   : > { %864 = vst.msk [vmem:[%s1458_s5 + $0x18] sm:$0xff] %vm585_vm8, %v848_v38  ;;  %v860_v25 = vmul.f32 %v962_v23, %v960_v13  ;;  %865 = vst.msk [vmem:[%s1458_s5 + $0x20] sm:$0xff] %vm585_vm8, %v849_v39 }
 0x1e8   : > { %866 = vst.msk [vmem:[%s1458_s5 + $0x28] sm:$0xff] %vm585_vm8, %v850_v26  ;;  %867 = vst.msk [vmem:[%s1458_s5 + $0x30] sm:$0xff] %vm585_vm8, %v851_v41 }
 0x1e9   : > { %868 = vst.msk [vmem:[%s1458_s5 + $0x38] sm:$0xff] %vm585_vm8, %v852_v42  ;;  %869 = vst.msk [vmem:[%s1458_s5 + $0x40] sm:$0xff] %vm585_vm8, %v853_v43 }
 0x1ea   : > { %870 = vst.msk [vmem:[%s1458_s5 + $0x48] sm:$0xff] %vm585_vm8, %v854_v44  ;;  %871 = vst.msk [vmem:[%s1458_s5 + $0x50] sm:$0xff] %vm585_vm8, %v855_v27 }
 0x1eb   : > { %872 = vst.msk [vmem:[%s1458_s5 + $0x58] sm:$0xff] %vm585_vm8, %v856_v1  ;;  %873 = vst.msk [vmem:[%s1458_s5 + $0x60] sm:$0xff] %vm585_vm8, %v857_v33 }
 0x1ec   : > { %874 = vst.msk [vmem:[%s1458_s5 + $0x68] sm:$0xff] %vm585_vm8, %v858_v22  ;;  %875 = vst.msk [vmem:[%s1458_s5 + $0x70] sm:$0xff] %vm585_vm8, %v859_v24 }
 0x1ed   : > { %876 = vst.msk [vmem:[%s1458_s5 + $0x78] sm:$0xff] %vm585_vm8, %v860_v25 }
 0x1ee PF: > { %s17_s20 = sadd.s32 1, %s969_s20  }
 0x1ef   : > { %p14_p5 = scmp.ge.s32.totalorder %s17_s20, 6  }
 0x1f1   :  { %16 = sbr.rel (!%p14_p5) target bundleno = 3 (0x3), region = 71 }

</bundles_post_ra>
